<compile_context>
chip_gen: v7x
topology: tpu7x:2x2x1
jax: 0.10.0
libtpu: 0.0.40
codegen_flags: <defaults>
</compile_context>

<pallas_src>
import math
from typing import NamedTuple

import jax
import jax.numpy as jnp
from jax.experimental import pallas as pl
from jax.experimental.pallas import tpu as pltpu

_EPS = 1e-12   # F.normalize default eps


def _round_up(n, m):
    return ((n + m - 1) // m) * m


def _pick_tile(dim_pad, desired, granule):
    """Largest multiple of `granule` that divides dim_pad and is <= desired
    (falls back to `granule`).  dim_pad must be a multiple of granule."""
    m = dim_pad // granule
    d = min(max(desired // granule, 1), m)
    for cand in range(d, 0, -1):
        if m % cand == 0:
            return cand * granule
    return granule


class PreparedWeight(NamedTuple):
    w: jax.Array        # (D_pad, O_pad) in the MXU streaming dtype
    inv_w: jax.Array    # (1, O_pad) fp32 = 1/max(||w_col||, eps)
    d: int              # original input dim
    o: int              # original output dim


def prepare_norm_linear_weight(weight, mxu_dtype=jnp.bfloat16):
    """One-time weight prep: fp32 column norms, pad to (128-lane) granularity,
    cast to the streaming dtype.  Cache the result across calls."""
    D, O = weight.shape
    D_pad = _round_up(D, 128)
    O_pad = _round_up(O, 128)

    wf = weight.astype(jnp.float32)
    inv_w = 1.0 / jnp.maximum(jnp.sqrt(jnp.sum(wf * wf, axis=0, keepdims=True)), _EPS)

    if (D_pad, O_pad) != (D, O):
        w_p = jnp.zeros((D_pad, O_pad), weight.dtype).at[:D, :O].set(weight)
        inv_w = jnp.zeros((1, O_pad), jnp.float32).at[:, :O].set(inv_w)
    else:
        w_p = weight
    return PreparedWeight(w_p.astype(mxu_dtype), inv_w.astype(jnp.float32), D, O)


def _norm_linear_kernel(x_ref, w_ref, invx_ref, invw_ref, o_ref, acc_ref):
    k = pl.program_id(2)

    @pl.when(k == 0)
    def _():
        acc_ref[...] = jnp.zeros_like(acc_ref)

    # Raw matmul on the streaming dtype, fp32 accumulation on the MXU.
    acc_ref[...] += jnp.dot(x_ref[...], w_ref[...],
                            preferred_element_type=jnp.float32)

    @pl.when(k == pl.num_programs(2) - 1)
    def _():
        # (tm, tn) * (tm, 1) * (1, tn) — pure VPU scaling of the result tile.
        o_ref[...] = (acc_ref[...] * invx_ref[...] * invw_ref[...]).astype(o_ref.dtype)


def norm_linear(x, weight=None, *, prepared=None, mxu_dtype=jnp.bfloat16,
                tm=None, tn=None, tk=None, vmem_limit_bytes=None):
    """x: (B, D), weight: (D, O) -> (B, O) = normalize(x, dim=1) @ normalize(w, dim=0).

    Pass `prepared=prepare_norm_linear_weight(weight, ...)` to reuse the padded
    / bf16 weight and its fp32 column norms across calls.
    Use mxu_dtype=jnp.float32 for closer-to-exact fp32 matmul numerics
    (note: TPU default f32 matmul precision, not Precision.HIGHEST).
    """
    if prepared is None:
        prepared = prepare_norm_linear_weight(weight, mxu_dtype)

    B, D = x.shape
    assert D == prepared.d, "feature dims must match"
    O = prepared.o
    D_pad, O_pad = prepared.w.shape
    stream_dtype = prepared.w.dtype

    itemsize = jnp.dtype(stream_dtype).itemsize
    sub = {4: 8, 2: 16, 1: 32}[itemsize]        # dtype-aware sublane rounding
    B_pad = _round_up(B, sub)

    # inv_x from the original (fp32) x — exact F.normalize denominator.
    xf = x.astype(jnp.float32)
    inv_x = 1.0 / jnp.maximum(jnp.sqrt(jnp.sum(xf * xf, axis=1, keepdims=True)), _EPS)

    x_s = x.astype(stream_dtype)
    if (B_pad, D_pad) != (B, D):
        # Zero padding is exact: padded rows/cols contribute 0 and are sliced away.
        x_s = jnp.zeros((B_pad, D_pad), stream_dtype).at[:B, :D].set(x_s)
        inv_x = jnp.zeros((B_pad, 1), jnp.float32).at[:B, :].set(inv_x)

    # Tile selection: snapped to divisors of the padded dims (no ragged blocks,
    # no tile-sized padding).  Defaults keep total VMEM ~8 MiB (fits every gen).
    tm = _pick_tile(B_pad, tm or 256, sub)
    tn = _pick_tile(O_pad, tn or 512, 128)
    tk = _pick_tile(D_pad, tk or (2048 if itemsize <= 2 else 1024), 128)

    # v7x megacore: prefer >=2 parallel tiles so neither TensorCore idles.
    if (B_pad // tm) * (O_pad // tn) < 2:
        if O_pad // tn == 1 and O_pad >= 2 * 128:
            tn = _pick_tile(O_pad, O_pad // 2, 128)
        elif B_pad // tm == 1 and B_pad >= 2 * sub:
            tm = _pick_tile(B_pad, B_pad // 2, sub)

    grid = (B_pad // tm, O_pad // tn, D_pad // tk)   # reduction axis last

    out = pl.pallas_call(
        _norm_linear_kernel,
        out_shape=jax.ShapeDtypeStruct((B_pad, O_pad), x.dtype),
        grid_spec=pltpu.PrefetchScalarGridSpec(
            num_scalar_prefetch=0,
            grid=grid,
            in_specs=[
                pl.BlockSpec((tm, tk), lambda i, j, k: (i, k)),   # x stream
                pl.BlockSpec((tk, tn), lambda i, j, k: (k, j)),   # weight stream
                pl.BlockSpec((tm, 1), lambda i, j, k: (i, 0)),    # inv_x (fp32)
                pl.BlockSpec((1, tn), lambda i, j, k: (0, j)),    # inv_w (fp32)
            ],
            out_specs=pl.BlockSpec((tm, tn), lambda i, j, k: (i, j)),
            scratch_shapes=[pltpu.VMEM((tm, tn), jnp.float32)],   # fp32 accumulator
        ),
        compiler_params=pltpu.CompilerParams(
            dimension_semantics=("parallel", "parallel", "arbitrary"),
            vmem_limit_bytes=vmem_limit_bytes,
        ),
    )(x_s, prepared.w, inv_x, prepared.inv_w)
    return out[:B, :O]


def init_norm_linear_weight(key, n_in, n_out):
    """Matches nn.init.kaiming_uniform_(weight.t(), a=sqrt(5)):
    fan_in = n_in, gain = sqrt(1/3), bound = gain*sqrt(3/fan_in) = 1/sqrt(n_in)."""
    bound = 1.0 / math.sqrt(n_in)
    return jax.random.uniform(key, (n_in, n_out), dtype=jnp.float32,
                              minval=-bound, maxval=bound)


def _reference(x, weight):
    x_n = x / jnp.maximum(jnp.linalg.norm(x, axis=1, keepdims=True), _EPS)
    w_n = weight / jnp.maximum(jnp.linalg.norm(weight, axis=0, keepdims=True), _EPS)
    return jnp.dot(x_n, w_n, precision=jax.lax.Precision.HIGHEST)


if __name__ == "__main__":
    key = jax.random.PRNGKey(0)
    k_w, k_x, k_w2, k_x2 = jax.random.split(key, 4)

    # Small shapes consistent with the module: batch=8, input=32, output=16.
    B, D, O = 8, 32, 16
    weight = init_norm_linear_weight(k_w, D, O)
    x = jax.random.normal(k_x, (B, D), dtype=jnp.float32)
    ref = _reference(x, weight)

    # Default fast path: bf16 streams, fp32 accumulation / norms / scaling.
    out_bf16 = jax.block_until_ready(norm_linear(x, weight))
    assert out_bf16.shape == (B, O)
    assert jnp.allclose(out_bf16, ref, atol=2e-2, rtol=2e-2), "bf16 path mismatch"

    # fp32-operand path (TPU default f32 matmul precision).
    out_f32 = jax.block_until_ready(norm_linear(x, weight, mxu_dtype=jnp.float32))
    assert jnp.allclose(out_f32, ref, atol=2e-3, rtol=2e-3), "fp32 path mismatch"

    # Cached prepared weight + multi-tile grid (3x3x3: exercises M/N parallel
    # tiles, K accumulation and lane/sublane padding, B=40->48, O=300->384).
    B2, D2, O2 = 40, 384, 300
    w2 = init_norm_linear_weight(k_w2, D2, O2)
    x2 = jax.random.normal(k_x2, (B2, D2), dtype=jnp.float32)
    prep2 = prepare_norm_linear_weight(w2)               # reusable across calls
    out2 = jax.block_until_ready(
        norm_linear(x2, prepared=prep2, tm=16, tn=128, tk=128))
    assert out2.shape == (B2, O2)
    assert jnp.allclose(out2, _reference(x2, w2), atol=2e-2, rtol=2e-2), \
        "tiled bf16 path mismatch"

    print("KERNEL_OK")
</pallas_src>

<mosaic_0001>
module attributes {stable_mosaic.version = 11 : i64} {
  func.func @_norm_linear_kernel(%arg0: i32, %arg1: i32, %arg2: i32, %arg3: memref<16x128xbf16, #tpu.memory_space<vmem>>, %arg4: memref<128x128xbf16, #tpu.memory_space<vmem>>, %arg5: memref<16x1xf32, #tpu.memory_space<vmem>>, %arg6: memref<1x128xf32, #tpu.memory_space<vmem>>, %arg7: memref<16x128xf32, #tpu.memory_space<vmem>>, %arg8: memref<16x128xf32, #tpu.memory_space<vmem>>) attributes {dimension_semantics = [#tpu.dimension_semantics<parallel>, #tpu.dimension_semantics<parallel>, #tpu.dimension_semantics<arbitrary>], iteration_bounds = array<i64: 1, 1, 1>, scalar_prefetch = 0 : i64, scratch_operands = 1 : i64, tpu.core_type = #tpu.core_type<tc>, window_params = [{transform_indices = @transform_0, window_bounds = array<i64: 16, 128>}, {transform_indices = @transform_1, window_bounds = array<i64: 128, 128>}, {transform_indices = @transform_2, window_bounds = array<i64: 16, 1>}, {transform_indices = @transform_3, window_bounds = array<i64: 1, 128>}, {transform_indices = @transform_4, window_bounds = array<i64: 16, 128>}]} {
    %c0_i32 = arith.constant 0 : i32
    %0 = arith.cmpi eq, %arg2, %c0_i32 : i32
    %1 = arith.extui %0 : i1 to i32
    %c0_i32_0 = arith.constant 0 : i32
    %2 = arith.cmpi ne, %1, %c0_i32_0 : i32
    scf.if %2 {
      %cst_10 = arith.constant 0.000000e+00 : f32
      %12 = vector.broadcast %cst_10 : f32 to vector<16x128xf32>
      %c0_11 = arith.constant 0 : index
      %c0_12 = arith.constant 0 : index
      %13 = vector.load %arg8[%c0_11, %c0_12] : memref<16x128xf32, #tpu.memory_space<vmem>>, vector<16x128xf32>
      tpu.vector_store %arg8[%c0_11, %c0_12], %12 {strides = array<i32>} : memref<16x128xf32, #tpu.memory_space<vmem>>, vector<16x128xf32>,
    } else {
    }
    %c0 = arith.constant 0 : index
    %c0_1 = arith.constant 0 : index
    %3 = vector.load %arg8[%c0, %c0_1] : memref<16x128xf32, #tpu.memory_space<vmem>>, vector<16x128xf32>
    %c0_2 = arith.constant 0 : index
    %c0_3 = arith.constant 0 : index
    %4 = vector.load %arg3[%c0_2, %c0_3] : memref<16x128xbf16, #tpu.memory_space<vmem>>, vector<16x128xbf16>
    %c0_4 = arith.constant 0 : index
    %c0_5 = arith.constant 0 : index
    %5 = vector.load %arg4[%c0_4, %c0_5] : memref<128x128xbf16, #tpu.memory_space<vmem>>, vector<128x128xbf16>
    %cst = arith.constant dense<0.000000e+00> : vector<16x128xf32>
    %6 = tpu.matmul %4, %5, %cst {dimension_numbers = #tpu.dot_dimension_numbers<[1], [0], [0], [1], [0, 0, 1, 1], [], []>} : vector<16x128xbf16>, vector<128x128xbf16>, vector<16x128xf32> -> vector<16x128xf32>
    %7 = arith.addf %3, %6 : vector<16x128xf32>
    %c0_6 = arith.constant 0 : index
    %c0_7 = arith.constant 0 : index
    %8 = vector.load %arg8[%c0_6, %c0_7] : memref<16x128xf32, #tpu.memory_space<vmem>>, vector<16x128xf32>
    tpu.vector_store %arg8[%c0_6, %c0_7], %7 {strides = array<i32>} : memref<16x128xf32, #tpu.memory_space<vmem>>, vector<16x128xf32>,
    %c0_i32_8 = arith.constant 0 : i32
    %9 = arith.cmpi eq, %arg2, %c0_i32_8 : i32
    %10 = arith.extui %9 : i1 to i32
    %c0_i32_9 = arith.constant 0 : i32
    %11 = arith.cmpi ne, %10, %c0_i32_9 : i32
    scf.if %11 {
      %c0_10 = arith.constant 0 : index
      %c0_11 = arith.constant 0 : index
      %12 = vector.load %arg8[%c0_10, %c0_11] : memref<16x128xf32, #tpu.memory_space<vmem>>, vector<16x128xf32>
      %c0_12 = arith.constant 0 : index
      %c0_13 = arith.constant 0 : index
      %13 = vector.load %arg5[%c0_12, %c0_13] : memref<16x1xf32, #tpu.memory_space<vmem>>, vector<16x1xf32>
      %14 = vector.broadcast %13 : vector<16x1xf32> to vector<16x128xf32>
      %15 = arith.mulf %12, %14 : vector<16x128xf32>
      %c0_14 = arith.constant 0 : index
      %c0_15 = arith.constant 0 : index
      %16 = vector.load %arg6[%c0_14, %c0_15] : memref<1x128xf32, #tpu.memory_space<vmem>>, vector<1x128xf32>
      %17 = vector.broadcast %16 : vector<1x128xf32> to vector<16x128xf32>
      %18 = arith.mulf %15, %17 : vector<16x128xf32>
      %c0_16 = arith.constant 0 : index
      %c0_17 = arith.constant 0 : index
      %19 = vector.load %arg7[%c0_16, %c0_17] : memref<16x128xf32, #tpu.memory_space<vmem>>, vector<16x128xf32>
      tpu.vector_store %arg7[%c0_16, %c0_17], %18 {strides = array<i32>} : memref<16x128xf32, #tpu.memory_space<vmem>>, vector<16x128xf32>,
    } else {
    }
    return
  }
  func.func @transform_0(%arg0: i32, %arg1: i32, %arg2: i32) -> (i32, i32) {
    %c0_i32 = arith.constant 0 : i32
    return %arg0, %arg2 : i32, i32
  }
  func.func @transform_1(%arg0: i32, %arg1: i32, %arg2: i32) -> (i32, i32) {
    %c0_i32 = arith.constant 0 : i32
    return %arg2, %arg1 : i32, i32
  }
  func.func @transform_2(%arg0: i32, %arg1: i32, %arg2: i32) -> (i32, i32) {
    %c0_i32 = arith.constant 0 : i32
    %c0_i32_0 = arith.constant 0 : i32
    return %arg0, %c0_i32 : i32, i32
  }
  func.func @transform_3(%arg0: i32, %arg1: i32, %arg2: i32) -> (i32, i32) {
    %c0_i32 = arith.constant 0 : i32
    %c0_i32_0 = arith.constant 0 : i32
    return %c0_i32, %arg1 : i32, i32
  }
  func.func @transform_4(%arg0: i32, %arg1: i32, %arg2: i32) -> (i32, i32) {
    %c0_i32 = arith.constant 0 : i32
    return %arg0, %arg1 : i32, i32
  }
}

</mosaic_0001>

<bundles_post_ra>
// kernel: tpu_custom_call.1
= control target key start
LH: loop header
LB: loop body
LE: loop exit
PB: predicated region body
PF: predicated region fallthrough
CT: control target
= control target key end

     0   :  { %9 = vsyncpa [#allocation4], 0  ;;  %s381_s0 = inlined_call_operand.vmem [shape: bf16[16,128], index: 0, kind: input, shape index: {}]   ;;  %s382_s1 = inlined_call_operand.hbm [shape: bf16[128,128], index: 1, kind: input, shape index: {}]   ;;  %s383_s2 = inlined_call_operand.vmem [shape: f32[16,1], index: 2, kind: input, shape index: {}]   ;;  %s384_s3 = inlined_call_operand.vmem [shape: f32[1,128], index: 3, kind: input, shape index: {}]   ;;  %s385_s4 = inlined_call_operand.hbm [shape: f32[16,128], index: 4, kind: output, shape index: {}]  }
   0x1   :  { %10 = vsyncpa [#allocation5], 0  ;;  %s311_s15 = smov [#allocation3]   ;;  %s263_s19 = scalar_lea.hbm %s382_s1, 1024 }
   0x2   :  { %s18_s16 = sshll.u32 %s311_s15, 4  ;;  %p264_p0 = scmp.ne.s32.totalorder %s382_s1, %s263_s19  ;;  %s19_s16 = int_to_ptr.vmem [resolvable:$true] %s18_s16 }
   0x3   :  { %p267_p1 = scmp.lt.u32.totalorder %s263_s19, %s382_s1 }
   0x5   :  { %p269_p2 = pnand %p267_p1, %p264_p0 }
   0x7   :  { %272 = shalt.err (!%p269_p2)
}
   0x8   :  { %s273_s24 = scalar_lea.vmem %s19_s16, 1024  ;;  %p278_p4 = scmp.lt.s32.totalorder %s19_s16, %s19_s16 }
   0x9   :  { %p274_p3 = scmp.ne.s32.totalorder %s19_s16, %s273_s24  ;;  %p279_p5 = scmp.lt.s32.totalorder %s273_s24, %s273_s24 }
   0xb   :  { %p280_p6 = por %p279_p5, %p278_p4 }
   0xd   :  { %p281_p7 = pnand %p280_p6, %p274_p3 }
   0xf   :  { %284 = shalt.err (!%p281_p7)
}
  0x10   :  { %s312_s25 = smov 64   ;;  %s313_s26 = smov 4  }
  0x11   :  { %24 = dma.hbm_to_vmem [thread:$0]  %s382_s1, 1024, %s19_s16, [#allocation4], %s312_s25, %s312_s25, %s313_s26  }
  0x12   :  { %307 = dma.done.wait [#allocation4], 1024  }
  0x13   :  { %308 = vsyncadd [#allocation4], 4294966272  ;;  %v314_v0 = vmov 0.0   ;;  %vm315_vm0 = vmmov 0   ;;  %v316_v1 = vmov 0   ;;  %v254_v2 = vld [vmem:[#allocation3] sm:$0xff]  }
  0x14   :  { %224 = vmatprep.subr.bf16.mxu0 %v314_v0  ;;  %240 = vmatprep.mubr.msk.bf16.mxu0 %vm315_vm0, %v314_v0  ;;  %v255_v3 = vld [vmem:[#allocation3 + $0x8] sm:$0xff]   ;;  %v256_v4 = vld [vmem:[#allocation3 + $0x10] sm:$0xff]   ;;  %v163_v5 = vld [vmem:[%s383_s2] sm:$0xff]  ;;  %s317_s9 = smov [#allocation6]  }
  0x15   :  { %253 = vset.pattern.permute.xlu0 %v316_v1  ;;  %225 = vmatpush3.bf16.msra.mxu0 %v254_v2  ;;  %v257_v6 = vld [vmem:[#allocation3 + $0x18] sm:$0xff]   ;;  %v164_v7 = vld [vmem:[%s383_s2 + $0x8] sm:$0xff]  ;;  %v258_v8 = vld [vmem:[#allocation3 + $0x20] sm:$0xff]   ;;  %s193_s10 = sshll.u32 %s317_s9, 4  ;;  %s194_s10 = int_to_ptr.vmem [resolvable:$true] %s193_s10 }
  0x16   :  { %226 = vmatprep.subr.bf16.mxu0 %v314_v0  ;;  %167 = vperm.xlu0 %253, %v163_v5   ;;  %v259_v9 = vld [vmem:[#allocation3 + $0x28] sm:$0xff]   ;;  %v260_v10 = vld [vmem:[#allocation3 + $0x30] sm:$0xff]   ;;  %v261_v11 = vld [vmem:[#allocation3 + $0x38] sm:$0xff]   ;;  %p290_p9 = scmp.lt.s32.totalorder %s194_s10, %s194_s10 }
  0x17   :  { %v262_v12 = vld [vmem:[%s381_s0] sm:$0xff]   ;;  %s285_s0 = scalar_lea.vmem %s194_s10, 256 }
  0x18   :  { %v214_v15 = vld [vmem:[%s384_s3] ss:$0 sm:$0xff]  ;;  %p286_p8 = scmp.ne.s32.totalorder %s194_s10, %s285_s0  ;;  %p291_p10 = scmp.lt.s32.totalorder %s285_s0, %s285_s0 }
  0x19   :  { %227 = vmatpush3.bf16.msra.mxu0 %v255_v3 }
  0x1a   :  { %228 = vmatprep.subr.bf16.mxu0 %v314_v0  ;;  %172 = vperm.xlu0 %253, %v164_v7   ;;  %p292_p11 = por %p291_p10, %p290_p9 }
  0x1c   :  { %p293_p12 = pnand %p292_p11, %p286_p8 }
  0x1d   :  { %229 = vmatpush3.bf16.msra.mxu0 %v256_v4 }
  0x1e   :  { %230 = vmatprep.subr.bf16.mxu0 %v314_v0 }
  0x21   :  { %231 = vmatpush3.bf16.msra.mxu0 %v257_v6 }
  0x22   :  { %232 = vmatprep.subr.bf16.mxu0 %v314_v0 }
  0x25   :  { %233 = vmatpush3.bf16.msra.mxu0 %v258_v8 }
  0x26   :  { %234 = vmatprep.subr.bf16.mxu0 %v314_v0 }
  0x29   :  { %235 = vmatpush3.bf16.msra.mxu0 %v259_v9 }
  0x2a   :  { %236 = vmatprep.subr.bf16.mxu0 %v314_v0 }
  0x2d   :  { %237 = vmatpush3.bf16.msra.mxu0 %v260_v10 }
  0x2e   :  { %238 = vmatprep.subr.bf16.mxu0 %v314_v0 }
  0x31   :  { %239 = vmatpush3.bf16.msra.mxu0 %v261_v11 }
  0x34   :  { %241 = vmatmul.mubr.bf16.vlgmr.msra.gmra.mrb[0].mxu0 %v262_v12 }
  0x95   :  { %v168_v13 = vpop.permute.xlu0 %167 }
  0x99   :  { %v173_v18 = vpop.permute.xlu0 %172 }
 0x107   :  { %v147_v14 = vpop.f32.mrb[0].mxu0 }
 0x108   :  { %v175_v16 = vmul.f32 %v168_v13, %v147_v14  ;;  %v242_v17 = vpop.f32.mrb[1].mxu0 }
 0x109   :  { %v150_v19 = vpop.f32.mrb[2].mxu0 }
 0x10a   :  { %v184_v20 = vmul.f32 %v214_v15, %v175_v16  ;;  %v176_v21 = vmul.f32 %v173_v18, %v150_v19  ;;  %v243_v22 = vpop.f32.mrb[3].mxu0 }
 0x10c   :  { %186 = vst [vmem:[#allocation6] sm:$0xff] %v184_v20  ;;  %v185_v23 = vmul.f32 %v214_v15, %v176_v21 }
 0x10e   :  { %187 = vst [vmem:[#allocation6 + $0x8] sm:$0xff] %v185_v23 }
 0x10f   :  { %296 = shalt.err (!%p293_p12)
}
 0x110   :  { %s297_s12 = scalar_lea.hbm %s385_s4, 256 }
 0x111   :  { %p298_p13 = scmp.ne.s32.totalorder %s385_s4, %s297_s12  ;;  %p301_p0 = scmp.lt.u32.totalorder %s297_s12, %s385_s4 }
 0x113   :  { %p303_p1 = pnand %p301_p0, %p298_p13 }
 0x115   :  { %306 = shalt.err (!%p303_p1)
}
 0x116   :  { %s318_s17 = smov 128   ;;  %s319_s18 = smov 8  }
 0x117   :  { %199 = dma.vmem_to_hbm [thread:$0]  %s194_s10, 256, %s385_s4, [#allocation5], %s318_s17, %s318_s17, %s319_s18  }
 0x118   :  { %309 = dma.done.wait [#allocation5], 256  }
 0x119   :  { %310 = vsyncadd [#allocation5], 4294967040 }
 0x11a   :  { %203 = vsyncpa [#allocation4], 1 }
 0x11b   :  { %204 = vsyncpa [#allocation5], 1 }

</bundles_post_ra>
